<compile_context>
chip_gen: v6e
topology: v6e:2x2x1
jax: 0.10.0
libtpu: 0.0.40
codegen_flags: <defaults>
</compile_context>

<pallas_src>
import functools

import numpy as np
import jax
import jax.numpy as jnp
from jax.experimental import pallas as pl
from jax.experimental.pallas import tpu as pltpu


LANE = 128
SUBLANE = 8


def _round_up(x, m):
    return (x + m - 1) // m * m


# ----------------------------------------------------------------------------
# Fused trunk kernel: K inputs -> idv MLP (shared) -> joint MLP -> output
# ----------------------------------------------------------------------------
def _trunk_kernel(*refs, n_keys, n_idv, n_joint):
    pos = 0
    x_refs = refs[pos:pos + n_keys]
    pos += n_keys
    idv = [(refs[pos + 2 * i], refs[pos + 2 * i + 1]) for i in range(n_idv)]
    pos += 2 * n_idv
    j0_w = refs[pos:pos + n_keys]
    pos += n_keys
    j0_b = refs[pos]
    pos += 1
    jrest = [(refs[pos + 2 * i], refs[pos + 2 * i + 1])
             for i in range(n_joint - 1)]
    pos += 2 * (n_joint - 1)
    o_ref = refs[pos]

    cdt = x_refs[0].dtype  # MXU operand dtype (bf16); accumulate in f32.

    # --- Siamese (per-key) MLP: the same weights applied to every key. ------
    per_key = []
    for k in range(n_keys):
        h = x_refs[k][...]
        for (w_ref, b_ref) in idv:
            acc = jnp.dot(h, w_ref[...], preferred_element_type=jnp.float32)
            h = jnp.maximum(acc + b_ref[...], 0.0).astype(cdt)
        per_key.append(h)

    # --- Joint MLP, layer 0: hidden = concat_k(h_k) along features. ---------
    # Folded into a sum of per-key matmuls against the row-split weight, so no
    # lane concat / reshape is ever materialized.
    acc = jnp.dot(per_key[0], j0_w[0][...], preferred_element_type=jnp.float32)
    for k in range(1, n_keys):
        acc = acc + jnp.dot(per_key[k], j0_w[k][...],
                            preferred_element_type=jnp.float32)
    acc = jnp.maximum(acc + j0_b[...], 0.0)

    # --- Remaining joint layers. ---------------------------------------------
    for (w_ref, b_ref) in jrest:
        y = acc.astype(cdt)
        acc = jnp.dot(y, w_ref[...], preferred_element_type=jnp.float32)
        acc = jnp.maximum(acc + b_ref[...], 0.0)

    o_ref[...] = acc.astype(o_ref.dtype)  # lane-dense (tm, 128*m) store


# ----------------------------------------------------------------------------
# Wrapper: pad, build BlockSpecs, one pallas_call for the whole trunk.
# ----------------------------------------------------------------------------
def siamese_mlp_trunk(x_dict, packed, ordered_keys):
    n_keys = len(ordered_keys)
    bz = x_dict[ordered_keys[0]].shape[0]
    xs = [x_dict[k].reshape(bz, -1) for k in ordered_keys]
    D = xs[0].shape[1]
    Dp = _round_up(D, SUBLANE)
    cdt = packed["idv"][0][0].dtype

    # Row tiling: single block at small batch; "parallel" row axis so larger
    # batches shard across v7x's two TensorCores.
    Mp = _round_up(bz, SUBLANE)
    tm = min(Mp, 256)
    Mp = _round_up(Mp, tm)

    def prep(x):
        x = x.astype(cdt)
        if x.shape != (Mp, Dp):
            x = jnp.pad(x, ((0, Mp - bz), (0, Dp - D)))
        return x

    xs = [prep(x) for x in xs]

    n_idv = len(packed["idv"])
    n_joint = 1 + len(packed["joint"])
    out_p = (packed["joint"][-1][0].shape[1] if packed["joint"]
             else packed["joint0_ws"][0].shape[1])
    out_dim = packed["out_dim"]

    operands = list(xs)
    in_specs = [pl.BlockSpec((tm, Dp), lambda i: (i, 0)) for _ in xs]

    def add_full(a):
        # Full-array VMEM-resident block (weights/biases are tiny; grid-
        # constant). For production-scale weights on v7x (64 MiB VMEM), prefer
        # single-buffering the invariant weight or adding a K-reduction axis.
        operands.append(a)
        in_specs.append(pl.BlockSpec(a.shape, lambda i: (0, 0)))

    for (w, b) in packed["idv"]:
        add_full(w)
        add_full(b)
    for w in packed["joint0_ws"]:
        add_full(w)
    add_full(packed["joint0_b"])
    for (w, b) in packed["joint"]:
        add_full(w)
        add_full(b)

    kern = functools.partial(_trunk_kernel, n_keys=n_keys, n_idv=n_idv,
                             n_joint=n_joint)

    out = pl.pallas_call(
        kern,
        out_shape=jax.ShapeDtypeStruct((Mp, out_p), jnp.float32),
        grid_spec=pl.GridSpec(
            grid=(Mp // tm,),
            in_specs=in_specs,
            out_specs=pl.BlockSpec((tm, out_p), lambda i: (i, 0)),
        ),
        compiler_params=pltpu.CompilerParams(
            dimension_semantics=("parallel",)),
    )(*operands)
    return out[:bz, :out_dim]


# ----------------------------------------------------------------------------
# Deterministic parameter init (orthogonal, mirroring use_orth_init=True)
# ----------------------------------------------------------------------------
def orth_init(key, fan_in, fan_out, gain=float(np.sqrt(2.0))):
    n = max(fan_in, fan_out)
    a = jax.random.normal(key, (n, n), jnp.float32)
    q, _ = jnp.linalg.qr(a)
    # stored as (in, out) == transpose of torch Linear's (out, in) weight
    return (gain * q[:fan_in, :fan_out]).astype(jnp.float32)


def make_mlp_params(key, in_dim, hidden_sizes):
    params = []
    d = in_dim
    for h in hidden_sizes:
        key, wk = jax.random.split(key)
        w = orth_init(wk, d, h)
        b = jnp.zeros((h,), jnp.float32)
        params.append((w, b))
        d = h
    return params, key


def pack_trunk_params(idv_params, joint_params, in_dim, n_keys,
                      compute_dtype=jnp.bfloat16):
    """Pad all weights to lane-dense (·, 128*m) blocks; split the first joint
    weight into per-key row blocks; bf16 weights, f32 biases. Zero padding is
    exact: padded activation lanes are relu(0+0)=0 and padded weight rows are
    zero."""

    def pad_wb(w, b, rows_p):
        din, dout = w.shape
        dout_p = _round_up(dout, LANE)
        wp = jnp.zeros((rows_p, dout_p), compute_dtype)
        wp = wp.at[:din, :dout].set(w.astype(compute_dtype))
        bp = jnp.zeros((1, dout_p), jnp.float32).at[0, :dout].set(b.reshape(-1))
        return wp, bp, dout_p

    packed_idv = []
    prev_p = _round_up(in_dim, SUBLANE)
    for (w, b) in idv_params:
        wp, bp, prev_p = pad_wb(w, b, prev_p)
        packed_idv.append((wp, bp))

    # Joint layer 0: (K*H_last, J0) weight split into K row blocks, one per
    # key, each padded to the per-key padded hidden width.
    w0, b0 = joint_params[0]
    h_last = w0.shape[0] // n_keys
    j0_out = w0.shape[1]
    j0_out_p = _round_up(j0_out, LANE)
    joint0_ws = []
    for k in range(n_keys):
        wk = w0[k * h_last:(k + 1) * h_last]
        wkp = jnp.zeros((prev_p, j0_out_p), compute_dtype)
        wkp = wkp.at[:h_last, :j0_out].set(wk.astype(compute_dtype))
        joint0_ws.append(wkp)
    joint0_b = jnp.zeros((1, j0_out_p), jnp.float32).at[0, :j0_out].set(
        b0.reshape(-1))

    packed_joint = []
    prev_p = j0_out_p
    for (w, b) in joint_params[1:]:
        wp, bp, prev_p = pad_wb(w, b, prev_p)
        packed_joint.append((wp, bp))

    return dict(idv=packed_idv, joint0_ws=joint0_ws, joint0_b=joint0_b,
                joint=packed_joint, out_dim=joint_params[-1][0].shape[1])


if __name__ == "__main__":
    # Small shapes consistent with the module:
    #   ordered_keys = ("obs_a", "obs_b"), input_shape = (4, 4) -> D = 16
    #   siamese_hidden_sizes = [32, 32], joint_hidden_sizes = [32, 16], batch=8
    ordered_keys = ("obs_a", "obs_b")
    input_shape = (4, 4)
    siamese_hidden_sizes = [32, 32]
    joint_hidden_sizes = [32, 16]
    bz = 8

    key = jax.random.PRNGKey(0)
    key, ka, kb = jax.random.split(key, 3)
    x = {
        "obs_a": jax.random.normal(ka, (bz,) + input_shape, jnp.float32),
        "obs_b": jax.random.normal(kb, (bz,) + input_shape, jnp.float32),
    }

    D = int(np.prod(input_shape))
    idv_params, key = make_mlp_params(key, D, siamese_hidden_sizes)
    joint_in = siamese_hidden_sizes[-1] * len(ordered_keys)
    joint_params, key = make_mlp_params(key, joint_in, joint_hidden_sizes)
    packed = pack_trunk_params(idv_params, joint_params, D, len(ordered_keys))

    out = siamese_mlp_trunk(x, packed, ordered_keys)
    out = jax.block_until_ready(out)
    assert out.shape == (bz, joint_hidden_sizes[-1]), out.shape
    assert bool(jnp.all(jnp.isfinite(out)))
    print("KERNEL_OK")
</pallas_src>

<mosaic_0001>
module attributes {stable_mosaic.version = 11 : i64} {
  func.func @_trunk_kernel(%arg0: i32, %arg1: memref<8x16xbf16, #tpu.memory_space<vmem>>, %arg2: memref<8x16xbf16, #tpu.memory_space<vmem>>, %arg3: memref<16x128xbf16, #tpu.memory_space<vmem>>, %arg4: memref<1x128xf32, #tpu.memory_space<vmem>>, %arg5: memref<128x128xbf16, #tpu.memory_space<vmem>>, %arg6: memref<1x128xf32, #tpu.memory_space<vmem>>, %arg7: memref<128x128xbf16, #tpu.memory_space<vmem>>, %arg8: memref<128x128xbf16, #tpu.memory_space<vmem>>, %arg9: memref<1x128xf32, #tpu.memory_space<vmem>>, %arg10: memref<128x128xbf16, #tpu.memory_space<vmem>>, %arg11: memref<1x128xf32, #tpu.memory_space<vmem>>, %arg12: memref<8x128xf32, #tpu.memory_space<vmem>>) attributes {dimension_semantics = [#tpu.dimension_semantics<parallel>], iteration_bounds = array<i64: 1>, scalar_prefetch = 0 : i64, scratch_operands = 0 : i64, tpu.core_type = #tpu.core_type<tc>, window_params = [{transform_indices = @transform_0, window_bounds = array<i64: 8, 16>}, {transform_indices = @transform_1, window_bounds = array<i64: 8, 16>}, {pipeline_mode = #tpu.pipeline_mode<synchronous>, transform_indices = @transform_2, window_bounds = array<i64: 16, 128>}, {pipeline_mode = #tpu.pipeline_mode<synchronous>, transform_indices = @transform_3, window_bounds = array<i64: 1, 128>}, {pipeline_mode = #tpu.pipeline_mode<synchronous>, transform_indices = @transform_4, window_bounds = array<i64: 128, 128>}, {pipeline_mode = #tpu.pipeline_mode<synchronous>, transform_indices = @transform_5, window_bounds = array<i64: 1, 128>}, {pipeline_mode = #tpu.pipeline_mode<synchronous>, transform_indices = @transform_6, window_bounds = array<i64: 128, 128>}, {pipeline_mode = #tpu.pipeline_mode<synchronous>, transform_indices = @transform_7, window_bounds = array<i64: 128, 128>}, {pipeline_mode = #tpu.pipeline_mode<synchronous>, transform_indices = @transform_8, window_bounds = array<i64: 1, 128>}, {pipeline_mode = #tpu.pipeline_mode<synchronous>, transform_indices = @transform_9, window_bounds = array<i64: 128, 128>}, {pipeline_mode = #tpu.pipeline_mode<synchronous>, transform_indices = @transform_10, window_bounds = array<i64: 1, 128>}, {transform_indices = @transform_11, window_bounds = array<i64: 8, 128>}]} {
    %c0 = arith.constant 0 : index
    %c0_0 = arith.constant 0 : index
    %0 = vector.load %arg1[%c0, %c0_0] : memref<8x16xbf16, #tpu.memory_space<vmem>>, vector<8x16xbf16>
    %c0_1 = arith.constant 0 : index
    %c0_2 = arith.constant 0 : index
    %1 = vector.load %arg3[%c0_1, %c0_2] : memref<16x128xbf16, #tpu.memory_space<vmem>>, vector<16x128xbf16>
    %cst = arith.constant dense<0.000000e+00> : vector<8x128xf32>
    %2 = tpu.matmul %0, %1, %cst {dimension_numbers = #tpu.dot_dimension_numbers<[1], [0], [0], [1], [0, 0, 1, 1], [], []>} : vector<8x16xbf16>, vector<16x128xbf16>, vector<8x128xf32> -> vector<8x128xf32>
    %c0_3 = arith.constant 0 : index
    %c0_4 = arith.constant 0 : index
    %3 = vector.load %arg4[%c0_3, %c0_4] : memref<1x128xf32, #tpu.memory_space<vmem>>, vector<1x128xf32>
    %4 = vector.broadcast %3 : vector<1x128xf32> to vector<8x128xf32>
    %5 = arith.addf %2, %4 : vector<8x128xf32>
    %cst_5 = arith.constant 0.000000e+00 : f32
    %6 = vector.broadcast %cst_5 : f32 to vector<8x128xf32>
    %7 = arith.maximumf %5, %6 : vector<8x128xf32>
    %8 = arith.truncf %7 : vector<8x128xf32> to vector<8x128xbf16>
    %c0_6 = arith.constant 0 : index
    %c0_7 = arith.constant 0 : index
    %9 = vector.load %arg5[%c0_6, %c0_7] : memref<128x128xbf16, #tpu.memory_space<vmem>>, vector<128x128xbf16>
    %cst_8 = arith.constant dense<0.000000e+00> : vector<8x128xf32>
    %10 = tpu.matmul %8, %9, %cst_8 {dimension_numbers = #tpu.dot_dimension_numbers<[1], [0], [0], [1], [0, 0, 1, 1], [], []>} : vector<8x128xbf16>, vector<128x128xbf16>, vector<8x128xf32> -> vector<8x128xf32>
    %c0_9 = arith.constant 0 : index
    %c0_10 = arith.constant 0 : index
    %11 = vector.load %arg6[%c0_9, %c0_10] : memref<1x128xf32, #tpu.memory_space<vmem>>, vector<1x128xf32>
    %12 = vector.broadcast %11 : vector<1x128xf32> to vector<8x128xf32>
    %13 = arith.addf %10, %12 : vector<8x128xf32>
    %cst_11 = arith.constant 0.000000e+00 : f32
    %14 = vector.broadcast %cst_11 : f32 to vector<8x128xf32>
    %15 = arith.maximumf %13, %14 : vector<8x128xf32>
    %16 = arith.truncf %15 : vector<8x128xf32> to vector<8x128xbf16>
    %c0_12 = arith.constant 0 : index
    %c0_13 = arith.constant 0 : index
    %17 = vector.load %arg2[%c0_12, %c0_13] : memref<8x16xbf16, #tpu.memory_space<vmem>>, vector<8x16xbf16>
    %c0_14 = arith.constant 0 : index
    %c0_15 = arith.constant 0 : index
    %18 = vector.load %arg3[%c0_14, %c0_15] : memref<16x128xbf16, #tpu.memory_space<vmem>>, vector<16x128xbf16>
    %cst_16 = arith.constant dense<0.000000e+00> : vector<8x128xf32>
    %19 = tpu.matmul %17, %18, %cst_16 {dimension_numbers = #tpu.dot_dimension_numbers<[1], [0], [0], [1], [0, 0, 1, 1], [], []>} : vector<8x16xbf16>, vector<16x128xbf16>, vector<8x128xf32> -> vector<8x128xf32>
    %c0_17 = arith.constant 0 : index
    %c0_18 = arith.constant 0 : index
    %20 = vector.load %arg4[%c0_17, %c0_18] : memref<1x128xf32, #tpu.memory_space<vmem>>, vector<1x128xf32>
    %21 = vector.broadcast %20 : vector<1x128xf32> to vector<8x128xf32>
    %22 = arith.addf %19, %21 : vector<8x128xf32>
    %cst_19 = arith.constant 0.000000e+00 : f32
    %23 = vector.broadcast %cst_19 : f32 to vector<8x128xf32>
    %24 = arith.maximumf %22, %23 : vector<8x128xf32>
    %25 = arith.truncf %24 : vector<8x128xf32> to vector<8x128xbf16>
    %c0_20 = arith.constant 0 : index
    %c0_21 = arith.constant 0 : index
    %26 = vector.load %arg5[%c0_20, %c0_21] : memref<128x128xbf16, #tpu.memory_space<vmem>>, vector<128x128xbf16>
    %cst_22 = arith.constant dense<0.000000e+00> : vector<8x128xf32>
    %27 = tpu.matmul %25, %26, %cst_22 {dimension_numbers = #tpu.dot_dimension_numbers<[1], [0], [0], [1], [0, 0, 1, 1], [], []>} : vector<8x128xbf16>, vector<128x128xbf16>, vector<8x128xf32> -> vector<8x128xf32>
    %c0_23 = arith.constant 0 : index
    %c0_24 = arith.constant 0 : index
    %28 = vector.load %arg6[%c0_23, %c0_24] : memref<1x128xf32, #tpu.memory_space<vmem>>, vector<1x128xf32>
    %29 = vector.broadcast %28 : vector<1x128xf32> to vector<8x128xf32>
    %30 = arith.addf %27, %29 : vector<8x128xf32>
    %cst_25 = arith.constant 0.000000e+00 : f32
    %31 = vector.broadcast %cst_25 : f32 to vector<8x128xf32>
    %32 = arith.maximumf %30, %31 : vector<8x128xf32>
    %33 = arith.truncf %32 : vector<8x128xf32> to vector<8x128xbf16>
    %c0_26 = arith.constant 0 : index
    %c0_27 = arith.constant 0 : index
    %34 = vector.load %arg7[%c0_26, %c0_27] : memref<128x128xbf16, #tpu.memory_space<vmem>>, vector<128x128xbf16>
    %cst_28 = arith.constant dense<0.000000e+00> : vector<8x128xf32>
    %35 = tpu.matmul %16, %34, %cst_28 {dimension_numbers = #tpu.dot_dimension_numbers<[1], [0], [0], [1], [0, 0, 1, 1], [], []>} : vector<8x128xbf16>, vector<128x128xbf16>, vector<8x128xf32> -> vector<8x128xf32>
    %c0_29 = arith.constant 0 : index
    %c0_30 = arith.constant 0 : index
    %36 = vector.load %arg8[%c0_29, %c0_30] : memref<128x128xbf16, #tpu.memory_space<vmem>>, vector<128x128xbf16>
    %cst_31 = arith.constant dense<0.000000e+00> : vector<8x128xf32>
    %37 = tpu.matmul %33, %36, %cst_31 {dimension_numbers = #tpu.dot_dimension_numbers<[1], [0], [0], [1], [0, 0, 1, 1], [], []>} : vector<8x128xbf16>, vector<128x128xbf16>, vector<8x128xf32> -> vector<8x128xf32>
    %38 = arith.addf %35, %37 : vector<8x128xf32>
    %c0_32 = arith.constant 0 : index
    %c0_33 = arith.constant 0 : index
    %39 = vector.load %arg9[%c0_32, %c0_33] : memref<1x128xf32, #tpu.memory_space<vmem>>, vector<1x128xf32>
    %40 = vector.broadcast %39 : vector<1x128xf32> to vector<8x128xf32>
    %41 = arith.addf %38, %40 : vector<8x128xf32>
    %cst_34 = arith.constant 0.000000e+00 : f32
    %42 = vector.broadcast %cst_34 : f32 to vector<8x128xf32>
    %43 = arith.maximumf %41, %42 : vector<8x128xf32>
    %44 = arith.truncf %43 : vector<8x128xf32> to vector<8x128xbf16>
    %c0_35 = arith.constant 0 : index
    %c0_36 = arith.constant 0 : index
    %45 = vector.load %arg10[%c0_35, %c0_36] : memref<128x128xbf16, #tpu.memory_space<vmem>>, vector<128x128xbf16>
    %cst_37 = arith.constant dense<0.000000e+00> : vector<8x128xf32>
    %46 = tpu.matmul %44, %45, %cst_37 {dimension_numbers = #tpu.dot_dimension_numbers<[1], [0], [0], [1], [0, 0, 1, 1], [], []>} : vector<8x128xbf16>, vector<128x128xbf16>, vector<8x128xf32> -> vector<8x128xf32>
    %c0_38 = arith.constant 0 : index
    %c0_39 = arith.constant 0 : index
    %47 = vector.load %arg11[%c0_38, %c0_39] : memref<1x128xf32, #tpu.memory_space<vmem>>, vector<1x128xf32>
    %48 = vector.broadcast %47 : vector<1x128xf32> to vector<8x128xf32>
    %49 = arith.addf %46, %48 : vector<8x128xf32>
    %cst_40 = arith.constant 0.000000e+00 : f32
    %50 = vector.broadcast %cst_40 : f32 to vector<8x128xf32>
    %51 = arith.maximumf %49, %50 : vector<8x128xf32>
    %c0_41 = arith.constant 0 : index
    %c0_42 = arith.constant 0 : index
    %52 = vector.load %arg12[%c0_41, %c0_42] : memref<8x128xf32, #tpu.memory_space<vmem>>, vector<8x128xf32>
    tpu.vector_store %arg12[%c0_41, %c0_42], %51 {strides = array<i32>} : memref<8x128xf32, #tpu.memory_space<vmem>>, vector<8x128xf32>,
    return
  }
  func.func @transform_0(%arg0: i32) -> (i32, i32) {
    %c0_i32 = arith.constant 0 : i32
    %c0_i32_0 = arith.constant 0 : i32
    return %arg0, %c0_i32 : i32, i32
  }
  func.func @transform_1(%arg0: i32) -> (i32, i32) {
    %c0_i32 = arith.constant 0 : i32
    %c0_i32_0 = arith.constant 0 : i32
    return %arg0, %c0_i32 : i32, i32
  }
  func.func @transform_2(%arg0: i32) -> (i32, i32) {
    %c0_i32 = arith.constant 0 : i32
    %c0_i32_0 = arith.constant 0 : i32
    %c0_i32_1 = arith.constant 0 : i32
    return %c0_i32, %c0_i32_0 : i32, i32
  }
  func.func @transform_3(%arg0: i32) -> (i32, i32) {
    %c0_i32 = arith.constant 0 : i32
    %c0_i32_0 = arith.constant 0 : i32
    %c0_i32_1 = arith.constant 0 : i32
    return %c0_i32, %c0_i32_0 : i32, i32
  }
  func.func @transform_4(%arg0: i32) -> (i32, i32) {
    %c0_i32 = arith.constant 0 : i32
    %c0_i32_0 = arith.constant 0 : i32
    %c0_i32_1 = arith.constant 0 : i32
    return %c0_i32, %c0_i32_0 : i32, i32
  }
  func.func @transform_5(%arg0: i32) -> (i32, i32) {
    %c0_i32 = arith.constant 0 : i32
    %c0_i32_0 = arith.constant 0 : i32
    %c0_i32_1 = arith.constant 0 : i32
    return %c0_i32, %c0_i32_0 : i32, i32
  }
  func.func @transform_6(%arg0: i32) -> (i32, i32) {
    %c0_i32 = arith.constant 0 : i32
    %c0_i32_0 = arith.constant 0 : i32
    %c0_i32_1 = arith.constant 0 : i32
    return %c0_i32, %c0_i32_0 : i32, i32
  }
  func.func @transform_7(%arg0: i32) -> (i32, i32) {
    %c0_i32 = arith.constant 0 : i32
    %c0_i32_0 = arith.constant 0 : i32
    %c0_i32_1 = arith.constant 0 : i32
    return %c0_i32, %c0_i32_0 : i32, i32
  }
  func.func @transform_8(%arg0: i32) -> (i32, i32) {
    %c0_i32 = arith.constant 0 : i32
    %c0_i32_0 = arith.constant 0 : i32
    %c0_i32_1 = arith.constant 0 : i32
    return %c0_i32, %c0_i32_0 : i32, i32
  }
  func.func @transform_9(%arg0: i32) -> (i32, i32) {
    %c0_i32 = arith.constant 0 : i32
    %c0_i32_0 = arith.constant 0 : i32
    %c0_i32_1 = arith.constant 0 : i32
    return %c0_i32, %c0_i32_0 : i32, i32
  }
  func.func @transform_10(%arg0: i32) -> (i32, i32) {
    %c0_i32 = arith.constant 0 : i32
    %c0_i32_0 = arith.constant 0 : i32
    %c0_i32_1 = arith.constant 0 : i32
    return %c0_i32, %c0_i32_0 : i32, i32
  }
  func.func @transform_11(%arg0: i32) -> (i32, i32) {
    %c0_i32 = arith.constant 0 : i32
    %c0_i32_0 = arith.constant 0 : i32
    return %arg0, %c0_i32 : i32, i32
  }
}

</mosaic_0001>

<bundles_post_ra>
// kernel: tpu_custom_call.1
= control target key start
LH: loop header
LB: loop body
LE: loop exit
PB: predicated region body
PF: predicated region fallthrough
CT: control target
= control target key end

     0   :  { %16 = vsyncpa [#allocation3], 0  ;;  %s1339_s0 = inlined_call_operand.hbm [shape: bf16[8,16], index: 0, kind: input, shape index: {}]   ;;  %s1340_s1 = inlined_call_operand.hbm [shape: bf16[8,16], index: 1, kind: input, shape index: {}]   ;;  %s1341_s2 = inlined_call_operand.hbm [shape: bf16[16,128], index: 2, kind: input, shape index: {}]   ;;  %s1342_s3 = inlined_call_operand.vmem [shape: f32[1,128], index: 3, kind: input, shape index: {}]   ;;  %s1343_s4 = inlined_call_operand.hbm [shape: bf16[128,128], index: 4, kind: input, shape index: {}]   ;;  %s1344_s5 = inlined_call_operand.vmem [shape: f32[1,128], index: 5, kind: input, shape index: {}]   ;;  %s1345_s6 = inlined_call_operand.hbm [shape: bf16[128,128], index: 6, kind: input, shape index: {}]   ;;  %s1346_s7 = inlined_call_operand.hbm [shape: bf16[128,128], index: 7, kind: input, shape index: {}]   ;;  %s1347_s8 = inlined_call_operand.vmem [shape: f32[1,128], index: 8, kind: input, shape index: {}]   ;;  %s1348_s9 = inlined_call_operand.hbm [shape: bf16[128,128], index: 9, kind: input, shape index: {}]   ;;  %s1349_s10 = inlined_call_operand.vmem [shape: f32[1,128], index: 10, kind: input, shape index: {}]   ;;  %s1350_s11 = inlined_call_operand.hbm [shape: f32[8,128], index: 11, kind: output, shape index: {}]  }
   0x1   :  { %17 = vsyncpa [#allocation6], 0 }
   0x2   :  { %18 = vsyncpa [#allocation9], 0 }
   0x3   :  { %19 = vsyncpa [#allocation12], 0 }
   0x4   :  { %20 = vsyncpa [#allocation4], 0  ;;  %s1158_s17 = smov [#allocation5]  }
   0x5   :  { %s37_s18 = sshll.u32 %s1158_s17, 4  ;;  %s38_s18 = int_to_ptr.vmem [resolvable:$true] %s37_s18 }
   0x6   :  { %s996_s19 = scalar_lea.vmem %s38_s18, 64  ;;  %p1001_p1 = scmp.lt.s32.totalorder %s38_s18, %s38_s18 }
   0x7   :  { %p997_p0 = scmp.ne.s32.totalorder %s38_s18, %s996_s19  ;;  %p1002_p2 = scmp.lt.s32.totalorder %s996_s19, %s996_s19 }
   0x9   :  { %p1003_p3 = por %p1002_p2, %p1001_p1 }
   0xb   :  { %p1004_p4 = pnand %p1003_p3, %p997_p0 }
   0xd   :  { %1007 = shalt.err (!%p1004_p4)
}
   0xe   :  { %40 = dma.hbm_to_vmem [thread:$0]  %s1340_s1, 64, %s38_s18, [#allocation6]  }
   0xf   :  { %s1159_s22 = smov [#allocation8]   ;;  %s1160_s24 = smov [#allocation11]  }
  0x10   :  { %s60_s23 = sshll.u32 %s1159_s22, 4  ;;  %s86_s25 = sshll.u32 %s1160_s24, 4  ;;  %s61_s23 = int_to_ptr.vmem [resolvable:$true] %s60_s23  ;;  %s87_s25 = int_to_ptr.vmem [resolvable:$true] %s86_s25 }
  0x11   :  { %s1016_s26 = scalar_lea.vmem %s61_s23, 1024  ;;  %p1021_p6 = scmp.lt.s32.totalorder %s61_s23, %s61_s23 }
  0x12   :  { %p1017_p5 = scmp.ne.s32.totalorder %s61_s23, %s1016_s26  ;;  %p1022_p7 = scmp.lt.s32.totalorder %s1016_s26, %s1016_s26 }
  0x14   :  { %p1023_p8 = por %p1022_p7, %p1021_p6 }
  0x16   :  { %p1024_p9 = pnand %p1023_p8, %p1017_p5 }
  0x18   :  { %1027 = shalt.err (!%p1024_p9)
}
  0x19   :  { %s1161_s27 = smov 64   ;;  %s1162_s28 = smov 4  }
  0x1a   :  { %66 = dma.hbm_to_vmem [thread:$0]  %s1343_s4, 1024, %s61_s23, [#allocation9], %s1161_s27, %s1161_s27, %s1162_s28  }
  0x1b   :  { %s1036_s1 = scalar_lea.vmem %s87_s25, 1024  ;;  %p1041_p11 = scmp.lt.s32.totalorder %s87_s25, %s87_s25 }
  0x1c   :  { %p1037_p10 = scmp.ne.s32.totalorder %s87_s25, %s1036_s1  ;;  %p1042_p12 = scmp.lt.s32.totalorder %s1036_s1, %s1036_s1 }
  0x1e   :  { %p1043_p13 = por %p1042_p12, %p1041_p11 }
  0x20   :  { %p1044_p0 = pnand %p1043_p13, %p1037_p10 }
  0x22   :  { %1047 = shalt.err (!%p1044_p0)
}
  0x23   :  { %92 = dma.hbm_to_vmem [thread:$0]  %s1346_s7, 1024, %s87_s25, [#allocation12], %s1161_s27, %s1161_s27, %s1162_s28  }
  0x24   :  { %s1163_s14 = smov [#allocation2]   ;;  %s1164_s16 = smov [#allocation7]  }
  0x25   :  { %s27_s15 = sshll.u32 %s1163_s14, 4  ;;  %s46_s4 = sshll.u32 %s1164_s16, 4  ;;  %s28_s15 = int_to_ptr.vmem [resolvable:$true] %s27_s15  ;;  %s47_s4 = int_to_ptr.vmem [resolvable:$true] %s46_s4 }
  0x26   :  { %s1056_s17 = scalar_lea.vmem %s28_s15, 64  ;;  %p1061_p2 = scmp.lt.s32.totalorder %s28_s15, %s28_s15 }
  0x27   :  { %p1057_p1 = scmp.ne.s32.totalorder %s28_s15, %s1056_s17  ;;  %p1062_p3 = scmp.lt.s32.totalorder %s1056_s17, %s1056_s17 }
  0x29   :  { %p1063_p4 = por %p1062_p3, %p1061_p2 }
  0x2b   :  { %p1064_p5 = pnand %p1063_p4, %p1057_p1 }
  0x2d   :  { %1067 = shalt.err (!%p1064_p5)
}
  0x2e   :  { %30 = dma.hbm_to_vmem [thread:$0]  %s1339_s0, 64, %s28_s15, [#allocation3]  }
  0x2f   :  { %s1076_s20 = scalar_lea.vmem %s47_s4, 128  ;;  %p1081_p7 = scmp.lt.s32.totalorder %s47_s4, %s47_s4 }
  0x30   :  { %p1077_p6 = scmp.ne.s32.totalorder %s47_s4, %s1076_s20  ;;  %p1082_p8 = scmp.lt.s32.totalorder %s1076_s20, %s1076_s20 }
  0x32   :  { %p1083_p9 = por %p1082_p8, %p1081_p7 }
  0x34   :  { %p1084_p10 = pnand %p1083_p9, %p1077_p6 }
  0x36   :  { %1087 = shalt.err (!%p1084_p10)
}
  0x37   :  { %52 = dma.hbm_to_vmem [thread:$0]  %s1341_s2, 128, %s47_s4, [#allocation6], %s1161_s27, %s1161_s27, %s1162_s28  }
  0x38   :  { %s1165_s22 = smov [#allocation10]   ;;  %s1166_s24 = smov [#allocation13]  }
  0x39   :  { %s74_s23 = sshll.u32 %s1165_s22, 4  ;;  %s100_s0 = sshll.u32 %s1166_s24, 4  ;;  %s75_s23 = int_to_ptr.vmem [resolvable:$true] %s74_s23  ;;  %s101_s0 = int_to_ptr.vmem [resolvable:$true] %s100_s0 }
  0x3a   :  { %s1096_s25 = scalar_lea.vmem %s75_s23, 1024  ;;  %p1101_p12 = scmp.lt.s32.totalorder %s75_s23, %s75_s23 }
  0x3b   :  { %p1097_p11 = scmp.ne.s32.totalorder %s75_s23, %s1096_s25  ;;  %p1102_p13 = scmp.lt.s32.totalorder %s1096_s25, %s1096_s25 }
  0x3d   :  { %p1103_p0 = por %p1102_p13, %p1101_p12 }
  0x3f   :  { %p1104_p1 = pnand %p1103_p0, %p1097_p11 }
  0x41   :  { %1107 = shalt.err (!%p1104_p1)
}
  0x42   :  { %80 = dma.hbm_to_vmem [thread:$0]  %s1345_s6, 1024, %s75_s23, [#allocation9], %s1161_s27, %s1161_s27, %s1162_s28  }
  0x43   :  { %s1116_s2 = scalar_lea.vmem %s101_s0, 1024  ;;  %p1121_p3 = scmp.lt.s32.totalorder %s101_s0, %s101_s0 }
  0x44   :  { %p1117_p2 = scmp.ne.s32.totalorder %s101_s0, %s1116_s2  ;;  %p1122_p4 = scmp.lt.s32.totalorder %s1116_s2, %s1116_s2 }
  0x46   :  { %p1123_p5 = por %p1122_p4, %p1121_p3 }
  0x48   :  { %p1124_p6 = pnand %p1123_p5, %p1117_p2 }
  0x4a   :  { %1127 = shalt.err (!%p1124_p6)
}
  0x4b   :  { %106 = dma.hbm_to_vmem [thread:$0]  %s1348_s9, 1024, %s101_s0, [#allocation12], %s1161_s27, %s1161_s27, %s1162_s28  }
  0x4c   :  { %1148 = dma.done.wait [#allocation3], 64  }
  0x4d   :  { %1149 = vsyncadd [#allocation3], 4294967232 }
  0x4e   :  { %1150 = dma.done.wait [#allocation6], 192  }
  0x4f   :  { %1151 = vsyncadd [#allocation6], 4294967104 }
  0x50   :  { %1152 = dma.done.wait [#allocation9], 2048  }
  0x51   :  { %1153 = vsyncadd [#allocation9], 4294965248 }
  0x52   :  { %1154 = dma.done.wait [#allocation12], 2048  }
  0x53   :  { %1155 = vsyncadd [#allocation12], 4294965248  ;;  %v1167_v0 = vmov 0.0   ;;  %vm1168_vm0 = vmmov 0   ;;  %v955_v1 = vld [vmem:[#allocation7] sm:$0xff]   ;;  %vm147_vm1 = vcmask 130048  }
  0x54   :  { %831 = vmatprep.subr.bf16.mxu0 %v1167_v0  ;;  %833 = vmatprep.mubr.msk.bf16.mxu0 %vm1168_vm0, %v1167_v0  ;;  %v131_v2 = vld [vmem:[#allocation2] sm:$0xf]  ;;  %v956_v3 = vld [vmem:[#allocation8 + $0x38] sm:$0xff]   ;;  %v958_v5 = vld [vmem:[#allocation8 + $0x28] sm:$0xff]   ;;  %s1169_s14 = smov [#allocation14]  }
  0x55   :  { %837 = vmatprep.subr.bf16.mxu1 %v1167_v0  ;;  %853 = vmatprep.mubr.msk.bf16.mxu1 %vm1168_vm0, %v1167_v0  ;;  %v957_v4 = vld [vmem:[#allocation8 + $0x30] sm:$0xff]   ;;  %v959_v7 = vld [vmem:[#allocation8 + $0x20] sm:$0xff]   ;;  %v960_v8 = vld [vmem:[#allocation8 + $0x18] sm:$0xff]   ;;  %s731_s15 = sshll.u32 %s1169_s14, 4  ;;  %s732_s15 = int_to_ptr.vmem [resolvable:$true] %s731_s15 }
  0x56   :  { %832 = vmatpush3.bf16.msra.mxu0 %v955_v1  ;;  %838 = vmatpush3.bf16.msra.mxu1 %v956_v3  ;;  %v306_v6 = vld [vmem:[#allocation5] sm:$0xf]  ;;  %v962_v10 = vld [vmem:[#allocation8 + $0x8] sm:$0xff]   ;;  %v963_v11 = vld [vmem:[#allocation8] sm:$0xff]   ;;  %p1133_p8 = scmp.lt.s32.totalorder %s732_s15, %s732_s15 }
  0x57   :  { %857 = vmatprep.subr.bf16.mxu0 %v1167_v0  ;;  %839 = vmatprep.subr.bf16.mxu1 %v1167_v0  ;;  %v961_v9 = vld [vmem:[#allocation8 + $0x10] sm:$0xff]   ;;  %v966_v18 = vld [vmem:[#allocation11 + $0x38] sm:$0xff]   ;;  %v970_v28 = vld [vmem:[#allocation11 + $0x28] sm:$0xff]  }
  0x58   :  { %v743_v12 = vld [vmem:[%s1342_s3] ss:$0 sm:$0xff]  ;;  %v964_v27 = vld [vmem:[#allocation10 + $0x38] sm:$0xff]   ;;  %v972_v32 = vld [vmem:[#allocation11 + $0x20] sm:$0xff]  }
  0x59   :  { %834 = vmatmul.mubr.msk.bf16.vlgmr.msra.gmra.mxu0 %vm147_vm1, %v131_v2  ;;  %v968_v22 = vld [vmem:[#allocation11 + $0x30] sm:$0xff]   ;;  %v967_v33 = vld [vmem:[#allocation10 + $0x28] sm:$0xff]   ;;  %v969_v34 = vld [vmem:[#allocation10 + $0x20] sm:$0xff]  }
  0x5a   :  { %858 = vmatpush3.bf16.msra.mxu0 %v955_v1  ;;  %859 = vmatprep.mubr.msk.bf16.mxu0 %vm1168_vm0, %v1167_v0  ;;  %v965_v31 = vld [vmem:[#allocation10 + $0x30] sm:$0xff]   ;;  %v971_v35 = vld [vmem:[#allocation10 + $0x18] sm:$0xff]   ;;  %v975_v38 = vld [vmem:[#allocation10 + $0x8] sm:$0xff]  }
  0x5b   :  { %863 = vmatprep.subr.bf16.mxu0 %v1167_v0  ;;  %840 = vmatpush3.bf16.msra.mxu1 %v957_v4  ;;  %v973_v36 = vld [vmem:[#allocation10 + $0x10] sm:$0xff]   ;;  %v974_v37 = vld [vmem:[#allocation11 + $0x18] sm:$0xff]   ;;  %v977_v40 = vld [vmem:[#allocation10] sm:$0xff]  }
  0x5c   :  { %841 = vmatprep.subr.bf16.mxu1 %v1167_v0  ;;  %v976_v39 = vld [vmem:[#allocation11 + $0x10] sm:$0xff]   ;;  %v978_v41 = vld [vmem:[#allocation11 + $0x8] sm:$0xff]   ;;  %v979_v42 = vld [vmem:[#allocation11] sm:$0xff]  }
  0x5d   :  { %v746_v43 = vld [vmem:[%s1344_s5] ss:$0 sm:$0xff]  ;;  %v980_v56 = vld [vmem:[#allocation13 + $0x38] sm:$0xff]   ;;  %v982_v60 = vld [vmem:[#allocation13 + $0x28] sm:$0xff]  }
  0x5e   :  { %v981_v59 = vld [vmem:[#allocation13 + $0x30] sm:$0xff]   ;;  %v983_v61 = vld [vmem:[#allocation13 + $0x20] sm:$0xff]   ;;  %v984_v62 = vld [vmem:[#allocation13 + $0x18] sm:$0xff]  }
  0x5f   :  { %842 = vmatpush3.bf16.msra.mxu1 %v958_v5  ;;  %v985_v63 = vld [vmem:[#allocation13 + $0x10] sm:$0xff]   ;;  %v986_v1 = vld [vmem:[#allocation13 + $0x8] sm:$0xff]   ;;  %v987_v2 = vld [vmem:[#allocation13] sm:$0xff]  }
  0x60   :  { %843 = vmatprep.subr.bf16.mxu1 %v1167_v0 }
  0x61   :  { %860 = vmatmul.mubr.msk.bf16.vlgmr.msra.gmra.mxu0 %vm147_vm1, %v306_v6 }
  0x62   :  { %864 = vmatpush3.bf16.msra.mxu0 %v956_v3  ;;  %879 = vmatprep.mubr.msk.bf16.mxu0 %vm1168_vm0, %v1167_v0 }
  0x63   :  { %865 = vmatprep.subr.bf16.mxu0 %v1167_v0  ;;  %844 = vmatpush3.bf16.msra.mxu1 %v959_v7 }
  0x64   :  { %845 = vmatprep.subr.bf16.mxu1 %v1167_v0 }
  0x66   :  { %866 = vmatpush3.bf16.msra.mxu0 %v957_v4 }
  0x67   :  { %867 = vmatprep.subr.bf16.mxu0 %v1167_v0  ;;  %846 = vmatpush3.bf16.msra.mxu1 %v960_v8 }
  0x68   :  { %847 = vmatprep.subr.bf16.mxu1 %v1167_v0 }
  0x6a   :  { %868 = vmatpush3.bf16.msra.mxu0 %v958_v5 }
  0x6b   :  { %869 = vmatprep.subr.bf16.mxu0 %v1167_v0  ;;  %848 = vmatpush3.bf16.msra.mxu1 %v961_v9 }
  0x6c   :  { %849 = vmatprep.subr.bf16.mxu1 %v1167_v0 }
  0x6e   :  { %870 = vmatpush3.bf16.msra.mxu0 %v959_v7 }
  0x6f   :  { %871 = vmatprep.subr.bf16.mxu0 %v1167_v0  ;;  %850 = vmatpush3.bf16.msra.mxu1 %v962_v10 }
  0x70   :  { %851 = vmatprep.subr.bf16.mxu1 %v1167_v0 }
  0x72   :  { %872 = vmatpush3.bf16.msra.mxu0 %v960_v8  ;;  %v772_v8 = vld [vmem:[%s1347_s8] ss:$0 sm:$0xff]  ;;  %s1128_s8 = scalar_lea.vmem %s732_s15, 128 }
  0x73   :  { %873 = vmatprep.subr.bf16.mxu0 %v1167_v0  ;;  %852 = vmatpush3.bf16.msra.mxu1 %v963_v11  ;;  %p1129_p7 = scmp.ne.s32.totalorder %s732_s15, %s1128_s8  ;;  %p1134_p9 = scmp.lt.s32.totalorder %s1128_s8, %s1128_s8 }
  0x74   :  { %883 = vmatprep.subr.bf16.mxu1 %v1167_v0 }
  0x75   :  { %p1135_p10 = por %p1134_p9, %p1133_p8 }
  0x76   :  { %874 = vmatpush3.bf16.msra.mxu0 %v961_v9 }
  0x77   :  { %875 = vmatprep.subr.bf16.mxu0 %v1167_v0  ;;  %p1136_p11 = pnand %p1135_p10, %p1129_p7 }
  0x7a   :  { %876 = vmatpush3.bf16.msra.mxu0 %v962_v10 }
  0x7b   :  { %877 = vmatprep.subr.bf16.mxu0 %v1167_v0 }
  0x7e   :  { %878 = vmatpush3.bf16.msra.mxu0 %v963_v11 }
  0x7f   :  { %903 = vmatprep.subr.bf16.mxu0 %v1167_v0 }
 0x119   :  { %v185_v13 = vpop.f32.mrf.mxu0 }
 0x11a   :  { %v186_v14 = vadd.f32 %v743_v12, %v185_v13 }
 0x11b   :  { %v835_v15 = vpop.f32.mrf.mxu0 }
 0x11c   :  { %v191_v16 = vmax.f32 %v186_v14, 0.0 }
 0x11d   :  { %v188_v17 = vpop.f32.mrf.mxu0 }
 0x11e   :  { %v192_v19 = vpack.c.bf16 %v191_v16, %v191_v16 }
 0x11f   :  { %v836_v20 = vpop.f32.mrf.mxu0 }
 0x120   :  { %854 = vmatmul.mubr.bf16.vlgmr.msra.gmra.mxu1 %v192_v19 }
 0x121   :  { %v344_v21 = vpop.f32.mrf.mxu0  ;;  %884 = vmatpush3.bf16.msra.mxu1 %v966_v18  ;;  %899 = vmatprep.mubr.msk.bf16.mxu1 %vm1168_vm0, %v1167_v0 }
 0x122   :  { %v345_v23 = vadd.f32 %v743_v12, %v344_v21  ;;  %885 = vmatprep.subr.bf16.mxu1 %v1167_v0 }
 0x123   :  { %v861_v24 = vpop.f32.mrf.mxu0 }
 0x124   :  { %v350_v25 = vmax.f32 %v345_v23, 0.0 }
 0x125   :  { %v347_v26 = vpop.f32.mrf.mxu0  ;;  %886 = vmatpush3.bf16.msra.mxu1 %v968_v22 }
 0x126   :  { %v351_v29 = vpack.c.bf16 %v350_v25, %v350_v25  ;;  %887 = vmatprep.subr.bf16.mxu1 %v1167_v0 }
 0x127   :  { %v862_v30 = vpop.f32.mrf.mxu0 }
 0x128   :  { %880 = vmatmul.mubr.bf16.vlgmr.msra.gmra.mxu0 %v351_v29 }
 0x129   :  { %904 = vmatpush3.bf16.msra.mxu0 %v964_v27  ;;  %888 = vmatpush3.bf16.msra.mxu1 %v970_v28 }
 0x12a   :  { %905 = vmatprep.subr.bf16.mxu0 %v1167_v0  ;;  %889 = vmatprep.subr.bf16.mxu1 %v1167_v0 }
 0x12b   :  { %919 = vmatprep.mubr.msk.bf16.mxu0 %vm1168_vm0, %v1167_v0 }
 0x12d   :  { %906 = vmatpush3.bf16.msra.mxu0 %v965_v31  ;;  %890 = vmatpush3.bf16.msra.mxu1 %v972_v32 }
 0x12e   :  { %907 = vmatprep.subr.bf16.mxu0 %v1167_v0  ;;  %891 = vmatprep.subr.bf16.mxu1 %v1167_v0 }
 0x131   :  { %908 = vmatpush3.bf16.msra.mxu0 %v967_v33  ;;  %892 = vmatpush3.bf16.msra.mxu1 %v974_v37 }
 0x132   :  { %909 = vmatprep.subr.bf16.mxu0 %v1167_v0  ;;  %893 = vmatprep.subr.bf16.mxu1 %v1167_v0 }
 0x135   :  { %910 = vmatpush3.bf16.msra.mxu0 %v969_v34  ;;  %894 = vmatpush3.bf16.msra.mxu1 %v976_v39 }
 0x136   :  { %911 = vmatprep.subr.bf16.mxu0 %v1167_v0  ;;  %895 = vmatprep.subr.bf16.mxu1 %v1167_v0 }
 0x139   :  { %912 = vmatpush3.bf16.msra.mxu0 %v971_v35  ;;  %896 = vmatpush3.bf16.msra.mxu1 %v978_v41 }
 0x13a   :  { %913 = vmatprep.subr.bf16.mxu0 %v1167_v0  ;;  %897 = vmatprep.subr.bf16.mxu1 %v1167_v0 }
 0x13d   :  { %914 = vmatpush3.bf16.msra.mxu0 %v973_v36  ;;  %898 = vmatpush3.bf16.msra.mxu1 %v979_v42 }
 0x13e   :  { %915 = vmatprep.subr.bf16.mxu0 %v1167_v0  ;;  %923 = vmatprep.subr.bf16.mxu1 %v1167_v0 }
 0x141   :  { %916 = vmatpush3.bf16.msra.mxu0 %v975_v38 }
 0x142   :  { %917 = vmatprep.subr.bf16.mxu0 %v1167_v0 }
 0x145   :  { %918 = vmatpush3.bf16.msra.mxu0 %v977_v40 }
 0x1e0   :  { %v298_v44 = vpop.f32.mrf.mxu1 }
 0x1e1   :  { %v299_v45 = vadd.f32 %v746_v43, %v298_v44 }
 0x1e2   :  { %v855_v46 = vpop.f32.mrf.mxu1 }
 0x1e3   :  { %v304_v47 = vmax.f32 %v299_v45, 0.0 }
 0x1e4   :  { %v301_v48 = vpop.f32.mrf.mxu1 }
 0x1e5   :  { %v305_v49 = vpack.c.bf16 %v304_v47, %v304_v47 }
 0x1e6   :  { %v856_v50 = vpop.f32.mrf.mxu1 }
 0x1e7   :  { %920 = vmatmul.mubr.bf16.vlgmr.msra.gmra.mxu0 %v305_v49 }
 0x1e8   :  { %v386_v51 = vpop.f32.mrf.mxu0 }
 0x1e9   :  { %v387_v52 = vadd.f32 %v746_v43, %v386_v51 }
 0x1ea   :  { %v881_v53 = vpop.f32.mrf.mxu0 }
 0x1eb   :  { %v392_v54 = vmax.f32 %v387_v52, 0.0 }
 0x1ec   :  { %v389_v55 = vpop.f32.mrf.mxu0 }
 0x1ed   :  { %v393_v57 = vpack.c.bf16 %v392_v54, %v392_v54 }
 0x1ee   :  { %v882_v58 = vpop.f32.mrf.mxu0 }
 0x1ef   :  { %900 = vmatmul.mubr.bf16.vlgmr.msra.gmra.mxu1 %v393_v57 }
 0x1f0   :  { %924 = vmatpush3.bf16.msra.mxu1 %v980_v56  ;;  %939 = vmatprep.mubr.msk.bf16.mxu1 %vm1168_vm0, %v1167_v0 }
 0x1f1   :  { %925 = vmatprep.subr.bf16.mxu1 %v1167_v0 }
 0x1f4   :  { %926 = vmatpush3.bf16.msra.mxu1 %v981_v59 }
 0x1f5   :  { %927 = vmatprep.subr.bf16.mxu1 %v1167_v0 }
 0x1f8   :  { %928 = vmatpush3.bf16.msra.mxu1 %v982_v60 }
 0x1f9   :  { %929 = vmatprep.subr.bf16.mxu1 %v1167_v0 }
 0x1fc   :  { %930 = vmatpush3.bf16.msra.mxu1 %v983_v61 }
 0x1fd   :  { %931 = vmatprep.subr.bf16.mxu1 %v1167_v0 }
 0x200   :  { %932 = vmatpush3.bf16.msra.mxu1 %v984_v62 }
 0x201   :  { %933 = vmatprep.subr.bf16.mxu1 %v1167_v0 }
 0x204   :  { %934 = vmatpush3.bf16.msra.mxu1 %v985_v63 }
 0x205   :  { %935 = vmatprep.subr.bf16.mxu1 %v1167_v0 }
 0x208   :  { %936 = vmatpush3.bf16.msra.mxu1 %v986_v1 }
 0x209   :  { %937 = vmatprep.subr.bf16.mxu1 %v1167_v0  ;;  %v773_v0 = vld [vmem:[%s1349_s10] ss:$0 sm:$0xff] }
 0x20c   :  { %938 = vmatpush3.bf16.msra.mxu1 %v987_v2 }
 0x2a7   :  { %v596_v3 = vpop.f32.mrf.mxu0 }
 0x2a9   :  { %v921_v4 = vpop.f32.mrf.mxu0 }
 0x2ab   :  { %v599_v5 = vpop.f32.mrf.mxu0 }
 0x2ad   :  { %v922_v6 = vpop.f32.mrf.mxu0 }
 0x2af   :  { %v508_v7 = vpop.f32.mrf.mxu1 }
 0x2b0   :  { %v597_v9 = vadd.f32 %v596_v3, %v508_v7 }
 0x2b1   :  { %v901_v10 = vpop.f32.mrf.mxu1 }
 0x2b2   :  { %v609_v11 = vadd.f32 %v772_v8, %v597_v9 }
 0x2b3   :  { %v511_v12 = vpop.f32.mrf.mxu1 }
 0x2b4   :  { %v610_v13 = vmax.f32 %v609_v11, 0.0 }
 0x2b5   :  { %v902_v14 = vpop.f32.mrf.mxu1 }
 0x2b6   :  { %v611_v15 = vpack.c.bf16 %v610_v13, %v610_v13 }
 0x2b8   :  { %940 = vmatmul.mubr.bf16.vlgmr.msra.gmra.mxu1 %v611_v15 }
 0x378   :  { %v717_v16 = vpop.f32.mrf.mxu1 }
 0x379   :  { %v718_v17 = vadd.f32 %v773_v0, %v717_v16 }
 0x37a   :  { %v941_v18 = vpop.f32.mrf.mxu1 }
 0x37b   :  { %v723_v19 = vmax.f32 %v718_v17, 0.0 }
 0x37c   :  { %v720_v20 = vpop.f32.mrf.mxu1 }
 0x37d   :  { %724 = vst [vmem:[#allocation14] sm:$0xff] %v723_v19 }
 0x37e   :  { %v942_v21 = vpop.f32.mrf.mxu1 }
 0x37f   :  { %1139 = shalt.err (!%p1136_p11)
}
 0x380   :  { %734 = dma.vmem_to_hbm [thread:$0]  %s732_s15, 128, %s1350_s11, [#allocation4]  }
 0x381   :  { %1156 = dma.done.wait [#allocation4], 128  }
 0x382   :  { %1157 = vsyncadd [#allocation4], 4294967168 }
 0x383   :  { %738 = vsyncpa [#allocation3], 1 }
 0x384   :  { %739 = vsyncpa [#allocation6], 1 }
 0x385   :  { %740 = vsyncpa [#allocation9], 1 }
 0x386   :  { %741 = vsyncpa [#allocation12], 1 }
 0x387   :  { %742 = vsyncpa [#allocation4], 1 }

</bundles_post_ra>
